<compile_context>
chip_gen: v5e
topology: v5e:2x2
jax: 0.10.0
libtpu: 0.0.40
codegen_flags: <defaults>
</compile_context>

<pallas_src>
import math

import jax
import jax.numpy as jnp
from jax.experimental import pallas as pl
from jax.experimental.pallas import tpu as pltpu

_LANE = 128
_MAX_TILE_L = 8192
_VMEM_TILE_BUDGET = 8 * 1024 * 1024   # per-step working-set target


def _cdiv(a, b):
    return -(-a // b)


def _round_up(a, b):
    return _cdiv(a, b) * b


def _conv1d_relu_kernel(x_cur_ref, x_halo_ref, w_ref, b_ref, o_ref):
    """One (batch, length-tile) block of relu(conv1d(x) + b).

    x_cur_ref:  (C_in, TL)      current tile of the zero-padded input
    x_halo_ref: (C_in, 128)     the 128 padded-input columns after the tile
    w_ref:      (K, C_out, C_in) weights in the compute dtype (bf16 or f32)
    b_ref:      (C_out, 1)      f32 bias
    o_ref:      (C_out, TL)
    """
    K = w_ref.shape[0]
    TL = o_ref.shape[-1]
    cdt = w_ref.dtype

    if K > 1:
        # Lane-aligned concat (TL is a multiple of 128) -> one contiguous
        # (C_in, TL+128) value; the K shifted views below are XLU rotations,
        # not masked VMEM stores.
        x_full = jnp.concatenate(
            [x_cur_ref[...].astype(cdt), x_halo_ref[...].astype(cdt)],
            axis=-1)
    else:
        x_full = x_cur_ref[...].astype(cdt)

    # K is small & static -> unrolled tap matmuls, f32 accumulation.
    acc = jnp.dot(w_ref[0], x_full[:, 0:TL],
                  preferred_element_type=jnp.float32)
    for k in range(1, K):
        acc = acc + jnp.dot(w_ref[k], x_full[:, k:k + TL],
                            preferred_element_type=jnp.float32)
    acc = acc + b_ref[...]
    o_ref[...] = jnp.maximum(acc, 0.0).astype(o_ref.dtype)


def _tile_and_vmem(L_cols, C_in, C_out, K, in_it, out_it, c_it):
    """Pick the largest lane-dense length tile that fits the VMEM budget and
    derive a matching vmem_limit_bytes (with headroom)."""
    per_col = (2 * C_in * in_it          # double-buffered input tile
               + 2 * C_out * out_it      # double-buffered output tile
               + C_in * c_it             # x_full compute-dtype temp
               + 2 * C_out * 4)          # f32 acc + per-tap dot temp
    tl = (_VMEM_TILE_BUDGET // per_col) // _LANE * _LANE
    tl = max(_LANE, min(tl, _MAX_TILE_L, _round_up(L_cols, _LANE)))
    fixed = (2 * C_in * _LANE * in_it                    # double-buffered halo
             + K * C_out * C_in * c_it + 4 * C_out)      # weight + bias
    est = per_col * tl + fixed
    vmem_limit = int(min(64 * 1024 * 1024, 2 * est + 4 * 1024 * 1024))
    return tl, vmem_limit


def _run_tiled(x_pad, w3, b2, TL, nT, vmem_limit, out_dtype):
    """x_pad: (N, C_in, nT*TL + 128) pre-padded input -> (N, C_out, nT*TL)."""
    N, C_in, LIN = x_pad.shape
    K, C_out, _ = w3.shape
    LOP = nT * TL
    assert LIN == LOP + _LANE
    n_halo = TL // _LANE
    in_it = jnp.dtype(x_pad.dtype).itemsize
    out_it = jnp.dtype(out_dtype).itemsize
    w_it = jnp.dtype(w3.dtype).itemsize
    flops = 2 * N * K * C_in * C_out * LOP
    bytes_acc = (in_it * N * C_in * (LOP + nT * _LANE)
                 + w_it * K * C_out * C_in + 4 * C_out
                 + out_it * N * C_out * LOP)

    return pl.pallas_call(
        _conv1d_relu_kernel,
        out_shape=jax.ShapeDtypeStruct((N, C_out, LOP), out_dtype),
        grid_spec=pltpu.PrefetchScalarGridSpec(
            num_scalar_prefetch=0,
            grid=(N, nT),
            in_specs=[
                # current tile: TL-wide blocking along length
                pl.BlockSpec((None, C_in, TL), lambda n, j: (n, 0, j)),
                # right halo: 128-wide blocking over the SAME padded input
                pl.BlockSpec((None, C_in, _LANE),
                             lambda n, j: (n, 0, (j + 1) * n_halo)),
                pl.BlockSpec((K, C_out, C_in), lambda n, j: (0, 0, 0)),
                pl.BlockSpec((C_out, 1), lambda n, j: (0, 0)),
            ],
            out_specs=pl.BlockSpec((None, C_out, TL), lambda n, j: (n, 0, j)),
        ),
        compiler_params=pltpu.CompilerParams(
            dimension_semantics=("parallel", "parallel"),
            vmem_limit_bytes=vmem_limit),
        cost_estimate=pl.CostEstimate(
            flops=flops, transcendentals=0, bytes_accessed=bytes_acc),
    )(x_pad, x_pad, w3, b2)


def conv1d_relu(x, w, b, padding, *, compute_dtype=jnp.bfloat16):
    """relu(conv1d(x, w, b, stride=1, padding)) with PyTorch Conv1d semantics.

    x: (N, C_in, L), w: (C_out, C_in, K), b: (C_out,)
    returns (N, C_out, L + 2*padding - K + 1) in x.dtype.  MXU operands are
    cast to `compute_dtype` (default bf16); accumulation is always f32.
    """
    N, C_in, L = x.shape
    C_out, c_in_w, K = w.shape
    assert c_in_w == C_in
    assert K - 1 <= _LANE, "the 128-column halo design assumes K <= 129"
    L_out = L + 2 * padding - K + 1
    assert L_out >= 1

    w3 = jnp.transpose(w, (2, 0, 1)).astype(compute_dtype)   # (K, C_out, C_in)
    b2 = b.reshape(C_out, 1).astype(jnp.float32)
    in_it = jnp.dtype(x.dtype).itemsize
    out_it = in_it
    c_it = jnp.dtype(compute_dtype).itemsize

    if L_out >= 4 * _LANE:
        # ---- direct path: lane-dense length tiles per batch element ----
        TL, vmem_limit = _tile_and_vmem(L_out, C_in, C_out, K,
                                        in_it, out_it, c_it)
        nT = _cdiv(L_out, TL)
        LOP = nT * TL
        LIN = LOP + _LANE   # + trailing 128-column halo block
        x_pad = jnp.pad(x, ((0, 0), (0, 0), (padding, LIN - L - padding)))
        out = _run_tiled(x_pad, w3, b2, TL, nT, vmem_limit, x.dtype)
        return out[:, :, :L_out] if LOP != L_out else out

    # ---- short-sequence path: pack the batch along the length axis ----
    # Element n occupies columns [n*S, (n+1)*S) of one slab, S = L_out + K - 1
    # (= its individually zero-padded length), so no conv window reads another
    # element's data; gap/overhang output columns are discarded afterwards.
    S = L_out + K - 1                       # == L + 2*padding
    total = N * S
    TL, vmem_limit = _tile_and_vmem(total, C_in, C_out, K, in_it, out_it, c_it)
    nT = _cdiv(total, TL)
    LOP = nT * TL
    LIN = LOP + _LANE
    x_elem = jnp.pad(x, ((0, 0), (0, 0), (padding, padding)))        # (N,C_in,S)
    x_pack = jnp.transpose(x_elem, (1, 0, 2)).reshape(C_in, total)
    x_pack = jnp.pad(x_pack, ((0, 0), (0, LIN - total)))[None]       # (1,C_in,LIN)
    out = _run_tiled(x_pack, w3, b2, TL, nT, vmem_limit, x.dtype)    # (1,C_out,LOP)
    out = out[0, :, :total].reshape(C_out, N, S)
    out = jnp.transpose(out, (1, 0, 2))[:, :, :L_out]                # (N,C_out,L_out)
    return out


def _init_conv_params(key, out_channels, in_channels, kernel_size):
    """Deterministic init matching nn.Conv1d.reset_parameters():
    weight, bias ~ U(-1/sqrt(fan_in), 1/sqrt(fan_in)), fan_in = C_in * K."""
    kw, kb = jax.random.split(key)
    bound = 1.0 / math.sqrt(in_channels * kernel_size)
    w = jax.random.uniform(kw, (out_channels, in_channels, kernel_size),
                           jnp.float32, -bound, bound)
    b = jax.random.uniform(kb, (out_channels,), jnp.float32, -bound, bound)
    return w, b


class Conv1D:
    """JAX/Pallas port of the PyTorch Conv1D module (forward pass)."""

    def __init__(self, cnn_method, in_channels, cnn_kernel_num,
                 cnn_window_size, key, compute_dtype=jnp.bfloat16):
        assert cnn_method in ['naive', 'group3', 'group5']
        self.cnn_method = cnn_method
        self.in_channels = in_channels
        self.compute_dtype = compute_dtype
        if cnn_method == 'naive':
            self.w, self.b = _init_conv_params(
                key, cnn_kernel_num, in_channels, cnn_window_size)
            self.pad = (cnn_window_size - 1) // 2
        elif cnn_method == 'group3':
            assert cnn_kernel_num % 3 == 0
            k1, k2, k3 = jax.random.split(key, 3)
            co = cnn_kernel_num // 3
            self.w1, self.b1 = _init_conv_params(k1, co, in_channels, 1)
            self.w2, self.b2 = _init_conv_params(k2, co, in_channels, 3)
            self.w3, self.b3 = _init_conv_params(k3, co, in_channels, 5)
            # Fuse the three convs (K=1/p=0, K=3/p=1, K=5/p=2 all give
            # L_out == L) into ONE K=5 / pad=2 conv: each group's taps are
            # embedded at offset (2 - (K_g-1)//2); channel order matches
            # torch.cat([c1, c2, c3], dim=1).  relu(cat(..)) == cat(relu(..)).
            wf = jnp.zeros((cnn_kernel_num, in_channels, 5), jnp.float32)
            wf = wf.at[0 * co:1 * co, :, 2:3].set(self.w1)
            wf = wf.at[1 * co:2 * co, :, 1:4].set(self.w2)
            wf = wf.at[2 * co:3 * co, :, 0:5].set(self.w3)
            self.w_fused = wf
            self.b_fused = jnp.concatenate([self.b1, self.b2, self.b3], axis=0)
            self.pad = 2
        else:
            # TODO(synk): the 'group5' branch of the reference PyTorch code is
            # not reproducible as written - it concatenates a (B, C, 1) zero
            # tensor to a (B, C, L) feature along dim=1 (channels), which
            # raises a shape error for any L != 1; not implemented.
            raise NotImplementedError("group5 branch is buggy in the reference")

    def __call__(self, feature):
        # feature: (N, C_in, L) float32
        if self.cnn_method == 'naive':
            return conv1d_relu(feature, self.w, self.b, self.pad,
                               compute_dtype=self.compute_dtype)
        elif self.cnn_method == 'group3':
            # single fused pallas_call: input read once, no concat copy
            return conv1d_relu(feature, self.w_fused, self.b_fused, self.pad,
                               compute_dtype=self.compute_dtype)
        else:
            raise NotImplementedError


def _ref_conv1d_relu(x, w, b, padding, compute_dtype=jnp.float32):
    """Pure-JAX reference (correctness check only).  Operands rounded to
    compute_dtype like the kernel; accumulation in f32."""
    xc = x.astype(compute_dtype).astype(jnp.float32)
    wc = w.astype(compute_dtype).astype(jnp.float32)
    y = jax.lax.conv_general_dilated(
        xc, wc, window_strides=(1,), padding=[(padding, padding)],
        dimension_numbers=('NCH', 'OIH', 'NCH'),
        precision=jax.lax.Precision.HIGHEST)
    return jnp.maximum(y + b[None, :, None], 0.0)


if __name__ == "__main__":
    key = jax.random.PRNGKey(0)
    k_feat, k_naive, k_group3, k_feat2, k_big = jax.random.split(key, 5)

    # --- small 'naive' (packed short-sequence path, bf16 MXU operands) ---
    batch, in_channels, length = 2, 4, 16
    cnn_kernel_num, cnn_window_size = 6, 3
    feature = jax.random.normal(k_feat, (batch, in_channels, length),
                                jnp.float32)
    m_naive = Conv1D('naive', in_channels, cnn_kernel_num, cnn_window_size,
                     k_naive)
    out_naive = jax.block_until_ready(m_naive(feature))
    ref_naive = _ref_conv1d_relu(feature, m_naive.w, m_naive.b, m_naive.pad,
                                 jnp.bfloat16)
    assert out_naive.shape == (batch, cnn_kernel_num, length)
    assert jnp.allclose(out_naive, ref_naive, atol=1e-2, rtol=1e-2)

    # --- small 'group3' (fused single-kernel, packed path) ---
    m_g3 = Conv1D('group3', in_channels, cnn_kernel_num, cnn_window_size,
                  k_group3)
    out_g3 = jax.block_until_ready(m_g3(feature))
    ref_g3 = jnp.concatenate([
        _ref_conv1d_relu(feature, m_g3.w1, m_g3.b1, 0, jnp.bfloat16),
        _ref_conv1d_relu(feature, m_g3.w2, m_g3.b2, 1, jnp.bfloat16),
        _ref_conv1d_relu(feature, m_g3.w3, m_g3.b3, 2, jnp.bfloat16),
    ], axis=1)
    assert out_g3.shape == (batch, cnn_kernel_num, length)
    assert jnp.allclose(out_g3, ref_g3, atol=1e-2, rtol=1e-2)

    # --- larger 'naive' exercising the direct lane-tiled path, f32 compute ---
    batch2, cin2, L2 = 2, 8, 700
    knum2, kwin2 = 16, 5
    feature2 = jax.random.normal(k_feat2, (batch2, cin2, L2), jnp.float32)
    m_big = Conv1D('naive', cin2, knum2, kwin2, k_big,
                   compute_dtype=jnp.float32)
    out_big = jax.block_until_ready(m_big(feature2))
    ref_big = _ref_conv1d_relu(feature2, m_big.w, m_big.b, m_big.pad)
    assert out_big.shape == (batch2, knum2, L2)
    assert jnp.allclose(out_big, ref_big, atol=1e-4, rtol=1e-4)

    # --- same large case with the default bf16 MXU operands ---
    m_big_bf = Conv1D('naive', cin2, knum2, kwin2, k_big)
    out_big_bf = jax.block_until_ready(m_big_bf(feature2))
    ref_big_bf = _ref_conv1d_relu(feature2, m_big_bf.w, m_big_bf.b,
                                  m_big_bf.pad, jnp.bfloat16)
    assert jnp.allclose(out_big_bf, ref_big_bf, atol=1e-2, rtol=1e-2)

    print("KERNEL_OK")
</pallas_src>

<mosaic_0001>
module attributes {stable_mosaic.version = 11 : i64} {
  func.func @_conv1d_relu_kernel(%arg0: i32, %arg1: i32, %arg2: memref<1x4x128xf32, #tpu.memory_space<vmem>>, %arg3: memref<1x4x128xf32, #tpu.memory_space<vmem>>, %arg4: memref<3x6x4xbf16, #tpu.memory_space<vmem>>, %arg5: memref<6x1xf32, #tpu.memory_space<vmem>>, %arg6: memref<1x6x128xf32, #tpu.memory_space<vmem>>) attributes {dimension_semantics = [#tpu.dimension_semantics<parallel>, #tpu.dimension_semantics<parallel>], iteration_bounds = array<i64: 1, 1>, scalar_prefetch = 0 : i64, scratch_operands = 0 : i64, tpu.core_type = #tpu.core_type<tc>, window_params = [{transform_indices = @transform_0, window_bounds = array<i64: 1, 4, 128>}, {transform_indices = @transform_1, window_bounds = array<i64: 1, 4, 128>}, {pipeline_mode = #tpu.pipeline_mode<synchronous>, transform_indices = @transform_2, window_bounds = array<i64: 3, 6, 4>}, {pipeline_mode = #tpu.pipeline_mode<synchronous>, transform_indices = @transform_3, window_bounds = array<i64: 6, 1>}, {transform_indices = @transform_4, window_bounds = array<i64: 1, 6, 128>}]} {
    %c0 = arith.constant 0 : index
    %c0_0 = arith.constant 0 : index
    %c0_1 = arith.constant 0 : index
    %0 = vector.load %arg2[%c0, %c0_0, %c0_1] : memref<1x4x128xf32, #tpu.memory_space<vmem>>, vector<1x4x128xf32>
    %1 = vector.shape_cast %0 : vector<1x4x128xf32> to vector<4x128xf32>
    %2 = arith.truncf %1 : vector<4x128xf32> to vector<4x128xbf16>
    %c0_2 = arith.constant 0 : index
    %c0_3 = arith.constant 0 : index
    %c0_4 = arith.constant 0 : index
    %3 = vector.load %arg3[%c0_2, %c0_3, %c0_4] : memref<1x4x128xf32, #tpu.memory_space<vmem>>, vector<1x4x128xf32>
    %4 = vector.shape_cast %3 : vector<1x4x128xf32> to vector<4x128xf32>
    %5 = arith.truncf %4 : vector<4x128xf32> to vector<4x128xbf16>
    %6 = tpu.concatenate %2, %5 in 1 : vector<4x128xbf16>, vector<4x128xbf16> -> vector<4x256xbf16>
    %c0_5 = arith.constant 0 : index
    %c0_6 = arith.constant 0 : index
    %c0_7 = arith.constant 0 : index
    %7 = vector.load %arg4[%c0_5, %c0_6, %c0_7] : memref<3x6x4xbf16, #tpu.memory_space<vmem>>, vector<1x6x4xbf16>
    %8 = vector.shape_cast %7 : vector<1x6x4xbf16> to vector<6x4xbf16>
    %9 = vector.extract_strided_slice %6 {offsets = [0, 0], sizes = [4, 128], strides = [1, 1]} : vector<4x256xbf16> to vector<4x128xbf16>
    %cst = arith.constant dense<0.000000e+00> : vector<6x128xf32>
    %10 = tpu.matmul %8, %9, %cst {dimension_numbers = #tpu.dot_dimension_numbers<[1], [0], [0], [1], [0, 0, 1, 1], [], []>} : vector<6x4xbf16>, vector<4x128xbf16>, vector<6x128xf32> -> vector<6x128xf32>
    %c1 = arith.constant 1 : index
    %c0_8 = arith.constant 0 : index
    %c0_9 = arith.constant 0 : index
    %11 = vector.load %arg4[%c1, %c0_8, %c0_9] : memref<3x6x4xbf16, #tpu.memory_space<vmem>>, vector<1x6x4xbf16>
    %12 = vector.shape_cast %11 : vector<1x6x4xbf16> to vector<6x4xbf16>
    %13 = vector.extract_strided_slice %6 {offsets = [0, 1], sizes = [4, 128], strides = [1, 1]} : vector<4x256xbf16> to vector<4x128xbf16>
    %cst_10 = arith.constant dense<0.000000e+00> : vector<6x128xf32>
    %14 = tpu.matmul %12, %13, %cst_10 {dimension_numbers = #tpu.dot_dimension_numbers<[1], [0], [0], [1], [0, 0, 1, 1], [], []>} : vector<6x4xbf16>, vector<4x128xbf16>, vector<6x128xf32> -> vector<6x128xf32>
    %15 = arith.addf %10, %14 : vector<6x128xf32>
    %c2 = arith.constant 2 : index
    %c0_11 = arith.constant 0 : index
    %c0_12 = arith.constant 0 : index
    %16 = vector.load %arg4[%c2, %c0_11, %c0_12] : memref<3x6x4xbf16, #tpu.memory_space<vmem>>, vector<1x6x4xbf16>
    %17 = vector.shape_cast %16 : vector<1x6x4xbf16> to vector<6x4xbf16>
    %18 = vector.extract_strided_slice %6 {offsets = [0, 2], sizes = [4, 128], strides = [1, 1]} : vector<4x256xbf16> to vector<4x128xbf16>
    %cst_13 = arith.constant dense<0.000000e+00> : vector<6x128xf32>
    %19 = tpu.matmul %17, %18, %cst_13 {dimension_numbers = #tpu.dot_dimension_numbers<[1], [0], [0], [1], [0, 0, 1, 1], [], []>} : vector<6x4xbf16>, vector<4x128xbf16>, vector<6x128xf32> -> vector<6x128xf32>
    %20 = arith.addf %15, %19 : vector<6x128xf32>
    %c0_14 = arith.constant 0 : index
    %c0_15 = arith.constant 0 : index
    %21 = vector.load %arg5[%c0_14, %c0_15] : memref<6x1xf32, #tpu.memory_space<vmem>>, vector<6x1xf32>
    %22 = vector.broadcast %21 : vector<6x1xf32> to vector<6x128xf32>
    %23 = arith.addf %20, %22 : vector<6x128xf32>
    %cst_16 = arith.constant 0.000000e+00 : f32
    %24 = vector.broadcast %cst_16 : f32 to vector<6x128xf32>
    %25 = arith.maximumf %23, %24 : vector<6x128xf32>
    %c0_17 = arith.constant 0 : index
    %c0_18 = arith.constant 0 : index
    %c0_19 = arith.constant 0 : index
    %26 = vector.load %arg6[%c0_17, %c0_18, %c0_19] : memref<1x6x128xf32, #tpu.memory_space<vmem>>, vector<1x6x128xf32>
    %27 = vector.shape_cast %26 : vector<1x6x128xf32> to vector<6x128xf32>
    %28 = vector.shape_cast %25 : vector<6x128xf32> to vector<1x6x128xf32>
    tpu.vector_store %arg6[%c0_17, %c0_18, %c0_19], %28 {strides = array<i32>} : memref<1x6x128xf32, #tpu.memory_space<vmem>>, vector<1x6x128xf32>,
    return
  }
  func.func @transform_0(%arg0: i32, %arg1: i32) -> (i32, i32, i32) {
    %c0_i32 = arith.constant 0 : i32
    %c0_i32_0 = arith.constant 0 : i32
    return %arg0, %c0_i32, %arg1 : i32, i32, i32
  }
  func.func @transform_1(%arg0: i32, %arg1: i32) -> (i32, i32, i32) {
    %c1_i32 = arith.constant 1 : i32
    %0 = arith.addi %arg1, %c1_i32 : i32
    %c1_i32_0 = arith.constant 1 : i32
    %1 = arith.muli %0, %c1_i32_0 : i32
    %c0_i32 = arith.constant 0 : i32
    %c0_i32_1 = arith.constant 0 : i32
    return %arg0, %c0_i32, %1 : i32, i32, i32
  }
  func.func @transform_2(%arg0: i32, %arg1: i32) -> (i32, i32, i32) {
    %c0_i32 = arith.constant 0 : i32
    %c0_i32_0 = arith.constant 0 : i32
    %c0_i32_1 = arith.constant 0 : i32
    %c0_i32_2 = arith.constant 0 : i32
    return %c0_i32, %c0_i32_0, %c0_i32_1 : i32, i32, i32
  }
  func.func @transform_3(%arg0: i32, %arg1: i32) -> (i32, i32) {
    %c0_i32 = arith.constant 0 : i32
    %c0_i32_0 = arith.constant 0 : i32
    %c0_i32_1 = arith.constant 0 : i32
    return %c0_i32, %c0_i32_0 : i32, i32
  }
  func.func @transform_4(%arg0: i32, %arg1: i32) -> (i32, i32, i32) {
    %c0_i32 = arith.constant 0 : i32
    %c0_i32_0 = arith.constant 0 : i32
    return %arg0, %c0_i32, %arg1 : i32, i32, i32
  }
}

</mosaic_0001>

<bundles_post_ra>
// kernel: tpu_custom_call.1
= control target key start
LH: loop header
LB: loop body
LE: loop exit
PB: predicated region body
PF: predicated region fallthrough
CT: control target
= control target key end

     0   :  { %s148_s17 = smov 127   ;;  %s149_s18 = smov 126   ;;  %vm54_vm0 = vcmask 1041408   ;;  %vm50_vm1 = vcmask 31744   ;;  %v150_v7 = vmov 0   ;;  %vm48_vm2 = vcmask 1039360   ;;  %s203_s0 = inlined_call_operand.vmem [shape: f32[1,4,256], index: 0, kind: input, shape index: {}]   ;;  %s204_s1 = inlined_call_operand.vmem [shape: f32[1,4,256], index: 1, kind: input, shape index: {}]   ;;  %s205_s2 = inlined_call_operand.vmem [shape: bf16[3,6,4], index: 2, kind: input, shape index: {}]   ;;  %s206_s3 = inlined_call_operand.vmem [shape: f32[6,1], index: 3, kind: input, shape index: {}]   ;;  %s207_s4 = inlined_call_operand.vmem [shape: f32[1,6,128], index: 4, kind: output, shape index: {}]  }
   0x1   :  { %v35_v0 = vld [vmem:[%s203_s0] sm:$0xf]  ;;  %v137_v2 = vld [vmem:[%s204_s1 + $0x4] sm:$0xf]  ;;  %146 = vset.pattern.permute.xlu2 %v150_v7  ;;  %147 = vset.pattern.permute.xlu0 %v150_v7  ;;  %vm96_vm3 = vcmask 1031168  }
   0x2   :  { %v36_v1 = vpack.c.bf16 %v35_v0, %v35_v0  ;;  %v38_v3 = vpack.c.bf16 %v137_v2, %v137_v2  ;;  %v39_v5 = vld [vmem:[%s205_s2] sm:$0x7]  ;;  %v138_v16 = vld [vmem:[%s205_s2 + $0x4] sm:$0x7]  ;;  %v141_v17 = vld [vmem:[%s205_s2 + $0x8] sm:$0x7] }
   0x3   :  { %v118_v6 = vld [vmem:[%s206_s3] sm:$0x3f] }
   0x4   :  { %44 = vrot.lane.b32.xlu1 %v36_v1, %s148_s17  ;;  %92 = vrot.lane.b32.xlu0 %v36_v1, %s149_s18  ;;  %v75_v4 = vsel %vm54_vm0, %v36_v1, 0 }
   0x5   :  { %84 = vmatpush.bf16.msra.mxu1 %v75_v4  ;;  %121 = vperm.xlu2 %146, %v118_v6  }
   0x8   :  { %140 = vmatmul.msk.bf16.vlgmr.msra.gmra.mxu1 %vm50_vm1, %v39_v5 }
   0xc   :  { %46 = vrot.lane.b32.xlu1 %v38_v3, %s148_s17  ;;  %94 = vrot.lane.b32.xlu0 %v38_v3, %s149_s18 }
  0x5f   :  { %v122_v23 = vpop.permute.xlu2 %121 }
  0x76   :  { %v45_v8 = vpop.permute.xlu1 %44  ;;  %v93_v9 = vpop.permute.xlu0 %92 }
  0x7e   :  { %v47_v10 = vpop.permute.xlu1 %46  ;;  %v95_v11 = vpop.permute.xlu0 %94 }
  0x7f   :  { %v49_v12 = vsel %vm48_vm2, %v45_v8, %v47_v10  ;;  %v97_v13 = vsel %vm96_vm3, %v93_v9, %v95_v11 }
  0x80   :  { %v56_v14 = vsel %vm54_vm0, %v49_v12, 0  ;;  %v102_v15 = vsel %vm54_vm0, %v97_v13, 0 }
  0x81   :  { %65 = vmatpush.bf16.msra.mxu0 %v56_v14  ;;  %111 = vmatpush.bf16.msra.mxu2 %v102_v15 }
  0x84   :  { %139 = vmatmul.msk.bf16.vlgmr.msra.gmra.mxu0 %vm50_vm1, %v138_v16  ;;  %142 = vmatmul.msk.bf16.vlgmr.msra.gmra.mxu2 %vm50_vm1, %v141_v17 }
  0x85   :  { %v86_v18 = vpop.f32.mrf.mxu1 }
  0x8d   :  { %v88_v19 = vpop.f32.mrf.mxu1 }
 0x101   :  { %v67_v20 = vpop.f32.mrf.mxu0 }
 0x102   :  { %v87_v21 = vadd.f32 %v86_v18, %v67_v20 }
 0x107   :  { %v113_v22 = vpop.f32.mrf.mxu2 }
 0x108   :  { %v117_v24 = vadd.f32 %v113_v22, %v87_v21 }
 0x109   :  { %v69_v25 = vpop.f32.mrf.mxu0 }
 0x10a   :  { %v124_v26 = vadd.f32 %v122_v23, %v117_v24 }
 0x10c   :  { %v125_v27 = vmax.f32 %v124_v26, 0.0 }
 0x10e   :  { %126 = vst [vmem:[%s207_s4] sm:$0x3f] %v125_v27 }
 0x10f   :  { %v115_v28 = vpop.f32.mrf.mxu2 }

</bundles_post_ra>
